<compile_context>
chip_gen: v5e
topology: v5e:2x2
jax: 0.10.0
libtpu: 0.0.40
codegen_flags: <defaults>
</compile_context>

<pallas_src>
import functools

import jax
import jax.numpy as jnp
import numpy as np
from jax.experimental import pallas as pl
from jax.experimental.pallas import tpu as pltpu

EPS = 1e-5


# ------------------------------ fused kernel ---------------------------------
#
# Flat padded layout: spatial (H, W) lives on the lane axis, flattened with row width
# Wp >= W + 2*d.  The valid image occupies rows [d, d+H) and cols [d, d+W); everything
# else is zero.  A 3x3 tap (kh, kw) with dilation dd is a lane-offset slice of length
# L = H*Wp at offset kh*dd*Wp + kw*dd, so each conv is ONE dot of the stacked taps:
#   conv = dot(W_flat (Cout, 9*Cin_p), stack (9*Cin_p, L)).
# Results are in "res layout": row width Wp, only cols [0, W) valid; the wrapper strips
# the garbage columns after the pallas_call.

def _dual_path_kernel(x_ref, w1a_ref, b1a_ref, w1b_ref, b1b_ref,
                      w2a_ref, b2a_ref, w2b_ref, b2b_ref,
                      inter_mask_ref, col_mask_ref,
                      o_ref,
                      xp_ref, bpad_ref,
                      *, H, W, d, Wp):
    L = H * Wp                       # length of a conv result in res layout
    Lp = (H + 2 * d) * Wp + 2 * d    # padded-buffer length (tail so taps never run off)
    base = d * Wp + d                # flat offset of spatial (0, 0)
    Cin = x_ref.shape[1]
    C2 = b1b_ref.shape[0]

    # ---- build zero-padded x in VMEM scratch: zero only borders, copy interior -----
    zgap = jnp.zeros((Cin, Wp - W), jnp.float32)
    xp_ref[:, 0:base] = jnp.zeros((Cin, base), jnp.float32)
    for h in range(H):               # static unroll: one (Cin, W) row per step
        s = (h + d) * Wp + d
        xp_ref[:, s:s + W] = x_ref[0, :, h * W:(h + 1) * W]
        xp_ref[:, s + W:s + Wp] = zgap
    tail = (H + d) * Wp + d
    xp_ref[:, tail:Lp] = jnp.zeros((Cin, Lp - tail), jnp.float32)
    xp = xp_ref[...]                 # (Cin, Lp)

    # ---- path 1a: 1x1 conv (+folded BN) + ReLU on the padded layout ----------------
    # Padding positions would get relu(bias); the interior mask zeroes them so they act
    # as the zero padding required by the following 3x3 conv.
    a = jnp.dot(w1a_ref[...], xp, preferred_element_type=jnp.float32) + b1a_ref[...]
    a = jnp.maximum(a, 0.0) * inter_mask_ref[...]           # (C4p, Lp)

    # ---- path 1b: 3x3 conv, dilation 1, padding 1 (+folded BN, linear): ONE dot -----
    offs1 = [(d - 1 + kh) * Wp + (d - 1 + kw) for kh in range(3) for kw in range(3)]
    a_stack = jnp.concatenate([a[:, o:o + L] for o in offs1], axis=0)      # (9*C4p, L)
    out1 = jnp.dot(w1b_ref[...], a_stack,
                   preferred_element_type=jnp.float32) + b1b_ref[...]      # (C2, L)

    # ---- path 2a: 3x3 dilated conv (+folded BN) + ReLU: ONE dot ---------------------
    offs2 = [kh * d * Wp + kw * d for kh in range(3) for kw in range(3)]
    x_stack = jnp.concatenate([xp[:, o:o + L] for o in offs2], axis=0)     # (9*Cin, L)
    b = jnp.maximum(jnp.dot(w2a_ref[...], x_stack,
                            preferred_element_type=jnp.float32) + b2a_ref[...],
                    0.0)                                                    # (C2, L)

    # ---- re-embed b into a zero-padded layout (col_mask kills garbage columns, which
    #      land exactly on padding positions of the padded layout) --------------------
    bpad_ref[:, 0:base] = jnp.zeros((C2, base), jnp.float32)
    bpad_ref[:, base:base + L] = b * col_mask_ref[...]
    bpad_ref[:, base + L:Lp] = jnp.zeros((C2, Lp - base - L), jnp.float32)

    # ---- path 2b: 3x3 dilated conv (+folded BN, linear): ONE dot --------------------
    b_stack = jnp.concatenate([bpad_ref[:, o:o + L] for o in offs2], axis=0)  # (9*C2, L)
    out2 = jnp.dot(w2b_ref[...], b_stack,
                   preferred_element_type=jnp.float32) + b2b_ref[...]      # (C2, L)

    # ---- concat (channels on sublanes) + residual + ReLU, single lane-dense store ---
    x_res = xp[:, base:base + L]                                            # (Cin, L)
    out = jnp.maximum(jnp.concatenate([out1, out2], axis=0) + x_res, 0.0)
    o_ref[0, :, :] = out


# --------------------------------- wrapper ------------------------------------

def dual_path_block(x, params, dilation):
    """x: (N, Cin, H, W) float32, NCHW like the PyTorch module."""
    N, Cin, H, W = x.shape
    C4, C2 = Cin // 4, Cin // 2
    d = int(dilation)
    assert Cin % 8 == 0 and C2 % 8 == 0, "inplanes must be a multiple of 16"

    # Padded row width; bump so H*Wp is a multiple of 128 (lane-dense res layout) when
    # that costs only a little extra padding.
    Wp = W + 2 * d
    step = 128 // int(np.gcd(H, 128))
    Wp_aligned = int(-(-Wp // step) * step)
    if Wp_aligned <= Wp + 32:
        Wp = Wp_aligned
    L = H * Wp
    Lp = (H + 2 * d) * Wp + 2 * d
    C4p = int(-(-C4 // 8) * 8)       # pad path-1 channels to a multiple of 8 sublanes

    # Fold BN scale into the conv weights; flatten the 9 taps to (Cout, 9*Cin_path).
    def fold3x3_flat(w, s, ipad):    # w: (3,3,I,O), s: (O,) -> (O, 9*ipad)
        wt = jnp.transpose(w * s[None, None, None, :], (3, 0, 1, 2))   # (O,3,3,I)
        if ipad > wt.shape[3]:
            wt = jnp.concatenate(
                [wt, jnp.zeros((wt.shape[0], 3, 3, ipad - wt.shape[3]), wt.dtype)],
                axis=3)
        return wt.reshape(wt.shape[0], 9 * ipad)

    w1a = jnp.zeros((C4p, Cin), jnp.float32).at[:C4].set(
        jnp.transpose(params["w1a"] * params["s1a"][None, :]))         # (C4p, Cin)
    b1a = jnp.zeros((C4p, 1), jnp.float32).at[:C4].set(params["b1a"].reshape(C4, 1))
    w1b = fold3x3_flat(params["w1b"], params["s1b"], C4p)              # (C2, 9*C4p)
    b1b = params["b1b"].reshape(C2, 1)
    w2a = fold3x3_flat(params["w2a"], params["s2a"], Cin)              # (C2, 9*Cin)
    b2a = params["b2a"].reshape(C2, 1)
    w2b = fold3x3_flat(params["w2b"], params["s2b"], C2)               # (C2, 9*C2)
    b2b = params["b2b"].reshape(C2, 1)

    # Static masks for the flat padded layout (tiny compile-time constants).
    idx = np.arange(Lp)
    rows, cols = idx // Wp, idx % Wp
    inter_mask = jnp.asarray(((rows >= d) & (rows < d + H) &
                              (cols >= d) & (cols < d + W))
                             .astype(np.float32).reshape(1, Lp))
    col_mask = jnp.asarray(((np.arange(L) % Wp) < W)
                           .astype(np.float32).reshape(1, L))

    kernel = functools.partial(_dual_path_kernel, H=H, W=W, d=d, Wp=Wp)
    res = pl.pallas_call(
        kernel,
        out_shape=jax.ShapeDtypeStruct((N, Cin, L), jnp.float32),
        grid=(N,),
        in_specs=[
            pl.BlockSpec((1, Cin, H * W), lambda n: (n, 0, 0)),   # x, flat spatial
            pl.BlockSpec((C4p, Cin), lambda n: (0, 0)),           # w1a (scaled, T, pad)
            pl.BlockSpec((C4p, 1), lambda n: (0, 0)),             # b1a
            pl.BlockSpec((C2, 9 * C4p), lambda n: (0, 0)),        # w1b flat taps
            pl.BlockSpec((C2, 1), lambda n: (0, 0)),              # b1b
            pl.BlockSpec((C2, 9 * Cin), lambda n: (0, 0)),        # w2a flat taps
            pl.BlockSpec((C2, 1), lambda n: (0, 0)),              # b2a
            pl.BlockSpec((C2, 9 * C2), lambda n: (0, 0)),         # w2b flat taps
            pl.BlockSpec((C2, 1), lambda n: (0, 0)),              # b2b
            pl.BlockSpec((1, Lp), lambda n: (0, 0)),              # interior mask
            pl.BlockSpec((1, L), lambda n: (0, 0)),               # valid-col mask
        ],
        out_specs=pl.BlockSpec((1, Cin, L), lambda n: (n, 0, 0)),
        scratch_shapes=[
            pltpu.VMEM((Cin, Lp), jnp.float32),                   # padded x
            pltpu.VMEM((C2, Lp), jnp.float32),                    # padded b
        ],
        compiler_params=pltpu.CompilerParams(dimension_semantics=("parallel",)),
    )(x.reshape(N, Cin, H * W), w1a, b1a, w1b, b1b, w2a, b2a, w2b, b2b,
      inter_mask, col_mask)

    # Strip the Wp->W garbage columns of the res-layout slab (cheap XLA slice).
    return res.reshape(N, Cin, H, Wp)[:, :, :, :W]


# --------------------------- params & reference ------------------------------

def init_params(key, inplanes):
    c4, c2 = inplanes // 4, inplanes // 2
    ks = list(jax.random.split(key, 20))

    def conv_w(k, kh, kw, cin, cout):
        return jax.random.normal(k, (kh, kw, cin, cout), jnp.float32) / np.sqrt(kh * kw * cin)

    def bn_fold(kg, kb, km, kv, c):
        gamma = 1.0 + 0.1 * jax.random.normal(kg, (c,), jnp.float32)
        beta = 0.1 * jax.random.normal(kb, (c,), jnp.float32)
        mean = 0.1 * jax.random.normal(km, (c,), jnp.float32)
        var = jax.random.uniform(kv, (c,), jnp.float32, minval=0.5, maxval=1.5)
        scale = gamma / jnp.sqrt(var + EPS)
        bias = beta - mean * scale
        return scale, bias

    p = {}
    p["w1a"] = conv_w(ks[0], 1, 1, inplanes, c4)[0, 0]     # (Cin, Cout) for 1x1
    p["s1a"], p["b1a"] = bn_fold(ks[1], ks[2], ks[3], ks[4], c4)
    p["w1b"] = conv_w(ks[5], 3, 3, c4, c2)
    p["s1b"], p["b1b"] = bn_fold(ks[6], ks[7], ks[8], ks[9], c2)
    p["w2a"] = conv_w(ks[10], 3, 3, inplanes, c2)
    p["s2a"], p["b2a"] = bn_fold(ks[11], ks[12], ks[13], ks[14], c2)
    p["w2b"] = conv_w(ks[15], 3, 3, c2, c2)
    p["s2b"], p["b2b"] = bn_fold(ks[16], ks[17], ks[18], ks[19], c2)
    return p


def reference(x_nchw, params, dilation):
    x = jnp.transpose(x_nchw, (0, 2, 3, 1))

    def conv(inp, w, d):
        pad = 0 if w.shape[0] == 1 else d
        return jax.lax.conv_general_dilated(
            inp, w, window_strides=(1, 1), padding=[(pad, pad), (pad, pad)],
            rhs_dilation=(d, d), dimension_numbers=("NHWC", "HWIO", "NHWC"),
            precision=jax.lax.Precision.HIGHEST)

    w1a = params["w1a"][None, None]  # (1,1,Cin,Cout)
    a = jnp.maximum(conv(x, w1a, 1) * params["s1a"] + params["b1a"], 0.0)
    out1 = conv(a, params["w1b"], 1) * params["s1b"] + params["b1b"]
    b = jnp.maximum(conv(x, params["w2a"], dilation) * params["s2a"] + params["b2a"], 0.0)
    out2 = conv(b, params["w2b"], dilation) * params["s2b"] + params["b2b"]
    out = jnp.maximum(jnp.concatenate([out1, out2], axis=-1) + x, 0.0)
    return jnp.transpose(out, (0, 3, 1, 2))


# ---------------------------------- main --------------------------------------

if __name__ == "__main__":
    inplanes, dilation = 16, 2
    N, H, W = 2, 8, 8

    key = jax.random.PRNGKey(0)
    kx, kp = jax.random.split(key)
    x = jax.random.normal(kx, (N, inplanes, H, W), jnp.float32)  # NCHW, like PyTorch
    params = init_params(kp, inplanes)

    out = jax.jit(dual_path_block, static_argnums=2)(x, params, dilation)
    out = jax.block_until_ready(out)

    ref = reference(x, params, dilation)
    np.testing.assert_allclose(np.asarray(out), np.asarray(ref), rtol=1e-3, atol=1e-3)

    print("KERNEL_OK")
</pallas_src>

<mosaic_0001>
module attributes {stable_mosaic.version = 11 : i64} {
  func.func @_dual_path_kernel(%arg0: i32, %arg1: memref<1x16x64xf32, #tpu.memory_space<vmem>>, %arg2: memref<8x16xf32, #tpu.memory_space<vmem>>, %arg3: memref<8x1xf32, #tpu.memory_space<vmem>>, %arg4: memref<8x72xf32, #tpu.memory_space<vmem>>, %arg5: memref<8x1xf32, #tpu.memory_space<vmem>>, %arg6: memref<8x144xf32, #tpu.memory_space<vmem>>, %arg7: memref<8x1xf32, #tpu.memory_space<vmem>>, %arg8: memref<8x72xf32, #tpu.memory_space<vmem>>, %arg9: memref<8x1xf32, #tpu.memory_space<vmem>>, %arg10: memref<1x196xf32, #tpu.memory_space<vmem>>, %arg11: memref<1x128xf32, #tpu.memory_space<vmem>>, %arg12: memref<1x16x128xf32, #tpu.memory_space<vmem>>, %arg13: memref<16x196xf32, #tpu.memory_space<vmem>>, %arg14: memref<8x196xf32, #tpu.memory_space<vmem>>) attributes {dimension_semantics = [#tpu.dimension_semantics<parallel>], iteration_bounds = array<i64: 2>, scalar_prefetch = 0 : i64, scratch_operands = 2 : i64, tpu.core_type = #tpu.core_type<tc>, window_params = [{transform_indices = @transform_0, window_bounds = array<i64: 1, 16, 64>}, {pipeline_mode = #tpu.pipeline_mode<synchronous>, transform_indices = @transform_1, window_bounds = array<i64: 8, 16>}, {pipeline_mode = #tpu.pipeline_mode<synchronous>, transform_indices = @transform_2, window_bounds = array<i64: 8, 1>}, {pipeline_mode = #tpu.pipeline_mode<synchronous>, transform_indices = @transform_3, window_bounds = array<i64: 8, 72>}, {pipeline_mode = #tpu.pipeline_mode<synchronous>, transform_indices = @transform_4, window_bounds = array<i64: 8, 1>}, {pipeline_mode = #tpu.pipeline_mode<synchronous>, transform_indices = @transform_5, window_bounds = array<i64: 8, 144>}, {pipeline_mode = #tpu.pipeline_mode<synchronous>, transform_indices = @transform_6, window_bounds = array<i64: 8, 1>}, {pipeline_mode = #tpu.pipeline_mode<synchronous>, transform_indices = @transform_7, window_bounds = array<i64: 8, 72>}, {pipeline_mode = #tpu.pipeline_mode<synchronous>, transform_indices = @transform_8, window_bounds = array<i64: 8, 1>}, {pipeline_mode = #tpu.pipeline_mode<synchronous>, transform_indices = @transform_9, window_bounds = array<i64: 1, 196>}, {pipeline_mode = #tpu.pipeline_mode<synchronous>, transform_indices = @transform_10, window_bounds = array<i64: 1, 128>}, {transform_indices = @transform_11, window_bounds = array<i64: 1, 16, 128>}]} {
    %cst = arith.constant 0.000000e+00 : f32
    %0 = vector.broadcast %cst : f32 to vector<16x8xf32>
    %cst_0 = arith.constant 0.000000e+00 : f32
    %1 = vector.broadcast %cst_0 : f32 to vector<16x34xf32>
    %c0 = arith.constant 0 : index
    %c0_1 = arith.constant 0 : index
    %2 = vector.load %arg13[%c0, %c0_1] : memref<16x196xf32, #tpu.memory_space<vmem>>, vector<16x34xf32>
    tpu.vector_store %arg13[%c0, %c0_1], %1 {strides = array<i32>} : memref<16x196xf32, #tpu.memory_space<vmem>>, vector<16x34xf32>,
    %c0_2 = arith.constant 0 : index
    %c0_3 = arith.constant 0 : index
    %c0_4 = arith.constant 0 : index
    %3 = vector.load %arg1[%c0_2, %c0_3, %c0_4] : memref<1x16x64xf32, #tpu.memory_space<vmem>>, vector<1x16x8xf32>
    %4 = vector.shape_cast %3 : vector<1x16x8xf32> to vector<16x8xf32>
    %c0_5 = arith.constant 0 : index
    %c34 = arith.constant 34 : index
    %5 = vector.load %arg13[%c0_5, %c34] : memref<16x196xf32, #tpu.memory_space<vmem>>, vector<16x8xf32>
    tpu.vector_store %arg13[%c0_5, %c34], %4 {strides = array<i32>} : memref<16x196xf32, #tpu.memory_space<vmem>>, vector<16x8xf32>,
    %c0_6 = arith.constant 0 : index
    %c42 = arith.constant 42 : index
    %6 = vector.load %arg13[%c0_6, %c42] : memref<16x196xf32, #tpu.memory_space<vmem>>, vector<16x8xf32>
    tpu.vector_store %arg13[%c0_6, %c42], %0 {strides = array<i32>} : memref<16x196xf32, #tpu.memory_space<vmem>>, vector<16x8xf32>,
    %c0_7 = arith.constant 0 : index
    %c0_8 = arith.constant 0 : index
    %c8 = arith.constant 8 : index
    %7 = vector.load %arg1[%c0_7, %c0_8, %c8] : memref<1x16x64xf32, #tpu.memory_space<vmem>>, vector<1x16x8xf32>
    %8 = vector.shape_cast %7 : vector<1x16x8xf32> to vector<16x8xf32>
    %c0_9 = arith.constant 0 : index
    %c50 = arith.constant 50 : index
    %9 = vector.load %arg13[%c0_9, %c50] : memref<16x196xf32, #tpu.memory_space<vmem>>, vector<16x8xf32>
    tpu.vector_store %arg13[%c0_9, %c50], %8 {strides = array<i32>} : memref<16x196xf32, #tpu.memory_space<vmem>>, vector<16x8xf32>,
    %c0_10 = arith.constant 0 : index
    %c58 = arith.constant 58 : index
    %10 = vector.load %arg13[%c0_10, %c58] : memref<16x196xf32, #tpu.memory_space<vmem>>, vector<16x8xf32>
    tpu.vector_store %arg13[%c0_10, %c58], %0 {strides = array<i32>} : memref<16x196xf32, #tpu.memory_space<vmem>>, vector<16x8xf32>,
    %c0_11 = arith.constant 0 : index
    %c0_12 = arith.constant 0 : index
    %c16 = arith.constant 16 : index
    %11 = vector.load %arg1[%c0_11, %c0_12, %c16] : memref<1x16x64xf32, #tpu.memory_space<vmem>>, vector<1x16x8xf32>
    %12 = vector.shape_cast %11 : vector<1x16x8xf32> to vector<16x8xf32>
    %c0_13 = arith.constant 0 : index
    %c66 = arith.constant 66 : index
    %13 = vector.load %arg13[%c0_13, %c66] : memref<16x196xf32, #tpu.memory_space<vmem>>, vector<16x8xf32>
    tpu.vector_store %arg13[%c0_13, %c66], %12 {strides = array<i32>} : memref<16x196xf32, #tpu.memory_space<vmem>>, vector<16x8xf32>,
    %c0_14 = arith.constant 0 : index
    %c74 = arith.constant 74 : index
    %14 = vector.load %arg13[%c0_14, %c74] : memref<16x196xf32, #tpu.memory_space<vmem>>, vector<16x8xf32>
    tpu.vector_store %arg13[%c0_14, %c74], %0 {strides = array<i32>} : memref<16x196xf32, #tpu.memory_space<vmem>>, vector<16x8xf32>,
    %c0_15 = arith.constant 0 : index
    %c0_16 = arith.constant 0 : index
    %c24 = arith.constant 24 : index
    %15 = vector.load %arg1[%c0_15, %c0_16, %c24] : memref<1x16x64xf32, #tpu.memory_space<vmem>>, vector<1x16x8xf32>
    %16 = vector.shape_cast %15 : vector<1x16x8xf32> to vector<16x8xf32>
    %c0_17 = arith.constant 0 : index
    %c82 = arith.constant 82 : index
    %17 = vector.load %arg13[%c0_17, %c82] : memref<16x196xf32, #tpu.memory_space<vmem>>, vector<16x8xf32>
    tpu.vector_store %arg13[%c0_17, %c82], %16 {strides = array<i32>} : memref<16x196xf32, #tpu.memory_space<vmem>>, vector<16x8xf32>,
    %c0_18 = arith.constant 0 : index
    %c90 = arith.constant 90 : index
    %18 = vector.load %arg13[%c0_18, %c90] : memref<16x196xf32, #tpu.memory_space<vmem>>, vector<16x8xf32>
    tpu.vector_store %arg13[%c0_18, %c90], %0 {strides = array<i32>} : memref<16x196xf32, #tpu.memory_space<vmem>>, vector<16x8xf32>,
    %c0_19 = arith.constant 0 : index
    %c0_20 = arith.constant 0 : index
    %c32 = arith.constant 32 : index
    %19 = vector.load %arg1[%c0_19, %c0_20, %c32] : memref<1x16x64xf32, #tpu.memory_space<vmem>>, vector<1x16x8xf32>
    %20 = vector.shape_cast %19 : vector<1x16x8xf32> to vector<16x8xf32>
    %c0_21 = arith.constant 0 : index
    %c98 = arith.constant 98 : index
    %21 = vector.load %arg13[%c0_21, %c98] : memref<16x196xf32, #tpu.memory_space<vmem>>, vector<16x8xf32>
    tpu.vector_store %arg13[%c0_21, %c98], %20 {strides = array<i32>} : memref<16x196xf32, #tpu.memory_space<vmem>>, vector<16x8xf32>,
    %c0_22 = arith.constant 0 : index
    %c106 = arith.constant 106 : index
    %22 = vector.load %arg13[%c0_22, %c106] : memref<16x196xf32, #tpu.memory_space<vmem>>, vector<16x8xf32>
    tpu.vector_store %arg13[%c0_22, %c106], %0 {strides = array<i32>} : memref<16x196xf32, #tpu.memory_space<vmem>>, vector<16x8xf32>,
    %c0_23 = arith.constant 0 : index
    %c0_24 = arith.constant 0 : index
    %c40 = arith.constant 40 : index
    %23 = vector.load %arg1[%c0_23, %c0_24, %c40] : memref<1x16x64xf32, #tpu.memory_space<vmem>>, vector<1x16x8xf32>
    %24 = vector.shape_cast %23 : vector<1x16x8xf32> to vector<16x8xf32>
    %c0_25 = arith.constant 0 : index
    %c114 = arith.constant 114 : index
    %25 = vector.load %arg13[%c0_25, %c114] : memref<16x196xf32, #tpu.memory_space<vmem>>, vector<16x8xf32>
    tpu.vector_store %arg13[%c0_25, %c114], %24 {strides = array<i32>} : memref<16x196xf32, #tpu.memory_space<vmem>>, vector<16x8xf32>,
    %c0_26 = arith.constant 0 : index
    %c122 = arith.constant 122 : index
    %26 = vector.load %arg13[%c0_26, %c122] : memref<16x196xf32, #tpu.memory_space<vmem>>, vector<16x8xf32>
    tpu.vector_store %arg13[%c0_26, %c122], %0 {strides = array<i32>} : memref<16x196xf32, #tpu.memory_space<vmem>>, vector<16x8xf32>,
    %c0_27 = arith.constant 0 : index
    %c0_28 = arith.constant 0 : index
    %c48 = arith.constant 48 : index
    %27 = vector.load %arg1[%c0_27, %c0_28, %c48] : memref<1x16x64xf32, #tpu.memory_space<vmem>>, vector<1x16x8xf32>
    %28 = vector.shape_cast %27 : vector<1x16x8xf32> to vector<16x8xf32>
    %c0_29 = arith.constant 0 : index
    %c130 = arith.constant 130 : index
    %29 = vector.load %arg13[%c0_29, %c130] : memref<16x196xf32, #tpu.memory_space<vmem>>, vector<16x8xf32>
    tpu.vector_store %arg13[%c0_29, %c130], %28 {strides = array<i32>} : memref<16x196xf32, #tpu.memory_space<vmem>>, vector<16x8xf32>,
    %c0_30 = arith.constant 0 : index
    %c138 = arith.constant 138 : index
    %30 = vector.load %arg13[%c0_30, %c138] : memref<16x196xf32, #tpu.memory_space<vmem>>, vector<16x8xf32>
    tpu.vector_store %arg13[%c0_30, %c138], %0 {strides = array<i32>} : memref<16x196xf32, #tpu.memory_space<vmem>>, vector<16x8xf32>,
    %c0_31 = arith.constant 0 : index
    %c0_32 = arith.constant 0 : index
    %c56 = arith.constant 56 : index
    %31 = vector.load %arg1[%c0_31, %c0_32, %c56] : memref<1x16x64xf32, #tpu.memory_space<vmem>>, vector<1x16x8xf32>
    %32 = vector.shape_cast %31 : vector<1x16x8xf32> to vector<16x8xf32>
    %c0_33 = arith.constant 0 : index
    %c146 = arith.constant 146 : index
    %33 = vector.load %arg13[%c0_33, %c146] : memref<16x196xf32, #tpu.memory_space<vmem>>, vector<16x8xf32>
    tpu.vector_store %arg13[%c0_33, %c146], %32 {strides = array<i32>} : memref<16x196xf32, #tpu.memory_space<vmem>>, vector<16x8xf32>,
    %c0_34 = arith.constant 0 : index
    %c154 = arith.constant 154 : index
    %34 = vector.load %arg13[%c0_34, %c154] : memref<16x196xf32, #tpu.memory_space<vmem>>, vector<16x8xf32>
    tpu.vector_store %arg13[%c0_34, %c154], %0 {strides = array<i32>} : memref<16x196xf32, #tpu.memory_space<vmem>>, vector<16x8xf32>,
    %cst_35 = arith.constant 0.000000e+00 : f32
    %35 = vector.broadcast %cst_35 : f32 to vector<16x34xf32>
    %c0_36 = arith.constant 0 : index
    %c162 = arith.constant 162 : index
    %36 = vector.load %arg13[%c0_36, %c162] : memref<16x196xf32, #tpu.memory_space<vmem>>, vector<16x34xf32>
    tpu.vector_store %arg13[%c0_36, %c162], %35 {strides = array<i32>} : memref<16x196xf32, #tpu.memory_space<vmem>>, vector<16x34xf32>,
    %c0_37 = arith.constant 0 : index
    %c0_38 = arith.constant 0 : index
    %37 = vector.load %arg13[%c0_37, %c0_38] : memref<16x196xf32, #tpu.memory_space<vmem>>, vector<16x196xf32>
    %c0_39 = arith.constant 0 : index
    %c0_40 = arith.constant 0 : index
    %38 = vector.load %arg2[%c0_39, %c0_40] : memref<8x16xf32, #tpu.memory_space<vmem>>, vector<8x16xf32>
    %cst_41 = arith.constant dense<0.000000e+00> : vector<8x196xf32>
    %39 = tpu.matmul %38, %37, %cst_41 {dimension_numbers = #tpu.dot_dimension_numbers<[1], [0], [0], [1], [0, 0, 1, 1], [], []>} : vector<8x16xf32>, vector<16x196xf32>, vector<8x196xf32> -> vector<8x196xf32>
    %c0_42 = arith.constant 0 : index
    %c0_43 = arith.constant 0 : index
    %40 = vector.load %arg3[%c0_42, %c0_43] : memref<8x1xf32, #tpu.memory_space<vmem>>, vector<8x1xf32>
    %41 = vector.broadcast %40 : vector<8x1xf32> to vector<8x196xf32>
    %42 = arith.addf %39, %41 : vector<8x196xf32>
    %cst_44 = arith.constant 0.000000e+00 : f32
    %43 = vector.broadcast %cst_44 : f32 to vector<8x196xf32>
    %44 = arith.maximumf %42, %43 : vector<8x196xf32>
    %c0_45 = arith.constant 0 : index
    %c0_46 = arith.constant 0 : index
    %45 = vector.load %arg10[%c0_45, %c0_46] : memref<1x196xf32, #tpu.memory_space<vmem>>, vector<1x196xf32>
    %46 = vector.broadcast %45 : vector<1x196xf32> to vector<8x196xf32>
    %47 = arith.mulf %44, %46 : vector<8x196xf32>
    %48 = vector.extract_strided_slice %47 {offsets = [0, 17], sizes = [8, 128], strides = [1, 1]} : vector<8x196xf32> to vector<8x128xf32>
    %49 = vector.extract_strided_slice %47 {offsets = [0, 18], sizes = [8, 128], strides = [1, 1]} : vector<8x196xf32> to vector<8x128xf32>
    %50 = vector.extract_strided_slice %47 {offsets = [0, 19], sizes = [8, 128], strides = [1, 1]} : vector<8x196xf32> to vector<8x128xf32>
    %51 = vector.extract_strided_slice %47 {offsets = [0, 33], sizes = [8, 128], strides = [1, 1]} : vector<8x196xf32> to vector<8x128xf32>
    %52 = vector.extract_strided_slice %47 {offsets = [0, 34], sizes = [8, 128], strides = [1, 1]} : vector<8x196xf32> to vector<8x128xf32>
    %53 = vector.extract_strided_slice %47 {offsets = [0, 35], sizes = [8, 128], strides = [1, 1]} : vector<8x196xf32> to vector<8x128xf32>
    %54 = vector.extract_strided_slice %47 {offsets = [0, 49], sizes = [8, 128], strides = [1, 1]} : vector<8x196xf32> to vector<8x128xf32>
    %55 = vector.extract_strided_slice %47 {offsets = [0, 50], sizes = [8, 128], strides = [1, 1]} : vector<8x196xf32> to vector<8x128xf32>
    %56 = vector.extract_strided_slice %47 {offsets = [0, 51], sizes = [8, 128], strides = [1, 1]} : vector<8x196xf32> to vector<8x128xf32>
    %57 = tpu.concatenate %48, %49, %50, %51, %52, %53, %54, %55, %56 in 0 : vector<8x128xf32>, vector<8x128xf32>, vector<8x128xf32>, vector<8x128xf32>, vector<8x128xf32>, vector<8x128xf32>, vector<8x128xf32>, vector<8x128xf32>, vector<8x128xf32> -> vector<72x128xf32>
    %c0_47 = arith.constant 0 : index
    %c0_48 = arith.constant 0 : index
    %58 = vector.load %arg4[%c0_47, %c0_48] : memref<8x72xf32, #tpu.memory_space<vmem>>, vector<8x72xf32>
    %cst_49 = arith.constant dense<0.000000e+00> : vector<8x128xf32>
    %59 = tpu.matmul %58, %57, %cst_49 {dimension_numbers = #tpu.dot_dimension_numbers<[1], [0], [0], [1], [0, 0, 1, 1], [], []>} : vector<8x72xf32>, vector<72x128xf32>, vector<8x128xf32> -> vector<8x128xf32>
    %c0_50 = arith.constant 0 : index
    %c0_51 = arith.constant 0 : index
    %60 = vector.load %arg5[%c0_50, %c0_51] : memref<8x1xf32, #tpu.memory_space<vmem>>, vector<8x1xf32>
    %61 = vector.broadcast %60 : vector<8x1xf32> to vector<8x128xf32>
    %62 = arith.addf %59, %61 : vector<8x128xf32>
    %63 = vector.extract_strided_slice %37 {offsets = [0, 0], sizes = [16, 128], strides = [1, 1]} : vector<16x196xf32> to vector<16x128xf32>
    %64 = vector.extract_strided_slice %37 {offsets = [0, 2], sizes = [16, 128], strides = [1, 1]} : vector<16x196xf32> to vector<16x128xf32>
    %65 = vector.extract_strided_slice %37 {offsets = [0, 4], sizes = [16, 128], strides = [1, 1]} : vector<16x196xf32> to vector<16x128xf32>
    %66 = vector.extract_strided_slice %37 {offsets = [0, 32], sizes = [16, 128], strides = [1, 1]} : vector<16x196xf32> to vector<16x128xf32>
    %67 = vector.extract_strided_slice %37 {offsets = [0, 34], sizes = [16, 128], strides = [1, 1]} : vector<16x196xf32> to vector<16x128xf32>
    %68 = vector.extract_strided_slice %37 {offsets = [0, 36], sizes = [16, 128], strides = [1, 1]} : vector<16x196xf32> to vector<16x128xf32>
    %69 = vector.extract_strided_slice %37 {offsets = [0, 64], sizes = [16, 128], strides = [1, 1]} : vector<16x196xf32> to vector<16x128xf32>
    %70 = vector.extract_strided_slice %37 {offsets = [0, 66], sizes = [16, 128], strides = [1, 1]} : vector<16x196xf32> to vector<16x128xf32>
    %71 = vector.extract_strided_slice %37 {offsets = [0, 68], sizes = [16, 128], strides = [1, 1]} : vector<16x196xf32> to vector<16x128xf32>
    %72 = tpu.concatenate %63, %64, %65, %66, %67, %68, %69, %70, %71 in 0 : vector<16x128xf32>, vector<16x128xf32>, vector<16x128xf32>, vector<16x128xf32>, vector<16x128xf32>, vector<16x128xf32>, vector<16x128xf32>, vector<16x128xf32>, vector<16x128xf32> -> vector<144x128xf32>
    %c0_52 = arith.constant 0 : index
    %c0_53 = arith.constant 0 : index
    %73 = vector.load %arg6[%c0_52, %c0_53] : memref<8x144xf32, #tpu.memory_space<vmem>>, vector<8x144xf32>
    %cst_54 = arith.constant dense<0.000000e+00> : vector<8x128xf32>
    %74 = tpu.matmul %73, %72, %cst_54 {dimension_numbers = #tpu.dot_dimension_numbers<[1], [0], [0], [1], [0, 0, 1, 1], [], []>} : vector<8x144xf32>, vector<144x128xf32>, vector<8x128xf32> -> vector<8x128xf32>
    %c0_55 = arith.constant 0 : index
    %c0_56 = arith.constant 0 : index
    %75 = vector.load %arg7[%c0_55, %c0_56] : memref<8x1xf32, #tpu.memory_space<vmem>>, vector<8x1xf32>
    %76 = vector.broadcast %75 : vector<8x1xf32> to vector<8x128xf32>
    %77 = arith.addf %74, %76 : vector<8x128xf32>
    %cst_57 = arith.constant 0.000000e+00 : f32
    %78 = vector.broadcast %cst_57 : f32 to vector<8x128xf32>
    %79 = arith.maximumf %77, %78 : vector<8x128xf32>
    %cst_58 = arith.constant 0.000000e+00 : f32
    %80 = vector.broadcast %cst_58 : f32 to vector<8x34xf32>
    %c0_59 = arith.constant 0 : index
    %c0_60 = arith.constant 0 : index
    %81 = vector.load %arg14[%c0_59, %c0_60] : memref<8x196xf32, #tpu.memory_space<vmem>>, vector<8x34xf32>
    tpu.vector_store %arg14[%c0_59, %c0_60], %80 {strides = array<i32>} : memref<8x196xf32, #tpu.memory_space<vmem>>, vector<8x34xf32>,
    %c0_61 = arith.constant 0 : index
    %c0_62 = arith.constant 0 : index
    %82 = vector.load %arg11[%c0_61, %c0_62] : memref<1x128xf32, #tpu.memory_space<vmem>>, vector<1x128xf32>
    %83 = vector.broadcast %82 : vector<1x128xf32> to vector<8x128xf32>
    %84 = arith.mulf %79, %83 : vector<8x128xf32>
    %c0_63 = arith.constant 0 : index
    %c34_64 = arith.constant 34 : index
    %85 = vector.load %arg14[%c0_63, %c34_64] : memref<8x196xf32, #tpu.memory_space<vmem>>, vector<8x128xf32>
    tpu.vector_store %arg14[%c0_63, %c34_64], %84 {strides = array<i32>} : memref<8x196xf32, #tpu.memory_space<vmem>>, vector<8x128xf32>,
    %cst_65 = arith.constant 0.000000e+00 : f32
    %86 = vector.broadcast %cst_65 : f32 to vector<8x34xf32>
    %c0_66 = arith.constant 0 : index
    %c162_67 = arith.constant 162 : index
    %87 = vector.load %arg14[%c0_66, %c162_67] : memref<8x196xf32, #tpu.memory_space<vmem>>, vector<8x34xf32>
    tpu.vector_store %arg14[%c0_66, %c162_67], %86 {strides = array<i32>} : memref<8x196xf32, #tpu.memory_space<vmem>>, vector<8x34xf32>,
    %c0_68 = arith.constant 0 : index
    %c0_69 = arith.constant 0 : index
    %88 = vector.load %arg14[%c0_68, %c0_69] : memref<8x196xf32, #tpu.memory_space<vmem>>, vector<8x128xf32>
    %c0_70 = arith.constant 0 : index
    %c2 = arith.constant 2 : index
    %89 = vector.load %arg14[%c0_70, %c2] : memref<8x196xf32, #tpu.memory_space<vmem>>, vector<8x128xf32>
    %c0_71 = arith.constant 0 : index
    %c4 = arith.constant 4 : index
    %90 = vector.load %arg14[%c0_71, %c4] : memref<8x196xf32, #tpu.memory_space<vmem>>, vector<8x128xf32>
    %c0_72 = arith.constant 0 : index
    %c32_73 = arith.constant 32 : index
    %91 = vector.load %arg14[%c0_72, %c32_73] : memref<8x196xf32, #tpu.memory_space<vmem>>, vector<8x128xf32>
    %c0_74 = arith.constant 0 : index
    %c34_75 = arith.constant 34 : index
    %92 = vector.load %arg14[%c0_74, %c34_75] : memref<8x196xf32, #tpu.memory_space<vmem>>, vector<8x128xf32>
    %c0_76 = arith.constant 0 : index
    %c36 = arith.constant 36 : index
    %93 = vector.load %arg14[%c0_76, %c36] : memref<8x196xf32, #tpu.memory_space<vmem>>, vector<8x128xf32>
    %c0_77 = arith.constant 0 : index
    %c64 = arith.constant 64 : index
    %94 = vector.load %arg14[%c0_77, %c64] : memref<8x196xf32, #tpu.memory_space<vmem>>, vector<8x128xf32>
    %c0_78 = arith.constant 0 : index
    %c66_79 = arith.constant 66 : index
    %95 = vector.load %arg14[%c0_78, %c66_79] : memref<8x196xf32, #tpu.memory_space<vmem>>, vector<8x128xf32>
    %c0_80 = arith.constant 0 : index
    %c68 = arith.constant 68 : index
    %96 = vector.load %arg14[%c0_80, %c68] : memref<8x196xf32, #tpu.memory_space<vmem>>, vector<8x128xf32>
    %97 = tpu.concatenate %88, %89, %90, %91, %92, %93, %94, %95, %96 in 0 : vector<8x128xf32>, vector<8x128xf32>, vector<8x128xf32>, vector<8x128xf32>, vector<8x128xf32>, vector<8x128xf32>, vector<8x128xf32>, vector<8x128xf32>, vector<8x128xf32> -> vector<72x128xf32>
    %c0_81 = arith.constant 0 : index
    %c0_82 = arith.constant 0 : index
    %98 = vector.load %arg8[%c0_81, %c0_82] : memref<8x72xf32, #tpu.memory_space<vmem>>, vector<8x72xf32>
    %cst_83 = arith.constant dense<0.000000e+00> : vector<8x128xf32>
    %99 = tpu.matmul %98, %97, %cst_83 {dimension_numbers = #tpu.dot_dimension_numbers<[1], [0], [0], [1], [0, 0, 1, 1], [], []>} : vector<8x72xf32>, vector<72x128xf32>, vector<8x128xf32> -> vector<8x128xf32>
    %c0_84 = arith.constant 0 : index
    %c0_85 = arith.constant 0 : index
    %100 = vector.load %arg9[%c0_84, %c0_85] : memref<8x1xf32, #tpu.memory_space<vmem>>, vector<8x1xf32>
    %101 = vector.broadcast %100 : vector<8x1xf32> to vector<8x128xf32>
    %102 = arith.addf %99, %101 : vector<8x128xf32>
    %103 = vector.extract_strided_slice %37 {offsets = [0, 34], sizes = [16, 128], strides = [1, 1]} : vector<16x196xf32> to vector<16x128xf32>
    %104 = tpu.concatenate %62, %102 in 0 : vector<8x128xf32>, vector<8x128xf32> -> vector<16x128xf32>
    %105 = arith.addf %104, %103 : vector<16x128xf32>
    %cst_86 = arith.constant 0.000000e+00 : f32
    %106 = vector.broadcast %cst_86 : f32 to vector<16x128xf32>
    %107 = arith.maximumf %105, %106 : vector<16x128xf32>
    %c0_87 = arith.constant 0 : index
    %c0_88 = arith.constant 0 : index
    %c0_89 = arith.constant 0 : index
    %108 = vector.load %arg12[%c0_87, %c0_88, %c0_89] : memref<1x16x128xf32, #tpu.memory_space<vmem>>, vector<1x16x128xf32>
    %109 = vector.shape_cast %108 : vector<1x16x128xf32> to vector<16x128xf32>
    %110 = vector.shape_cast %107 : vector<16x128xf32> to vector<1x16x128xf32>
    tpu.vector_store %arg12[%c0_87, %c0_88, %c0_89], %110 {strides = array<i32>} : memref<1x16x128xf32, #tpu.memory_space<vmem>>, vector<1x16x128xf32>,
    return
  }
  func.func @transform_0(%arg0: i32) -> (i32, i32, i32) {
    %c0_i32 = arith.constant 0 : i32
    %c0_i32_0 = arith.constant 0 : i32
    %c0_i32_1 = arith.constant 0 : i32
    return %arg0, %c0_i32, %c0_i32_0 : i32, i32, i32
  }
  func.func @transform_1(%arg0: i32) -> (i32, i32) {
    %c0_i32 = arith.constant 0 : i32
    %c0_i32_0 = arith.constant 0 : i32
    %c0_i32_1 = arith.constant 0 : i32
    return %c0_i32, %c0_i32_0 : i32, i32
  }
  func.func @transform_2(%arg0: i32) -> (i32, i32) {
    %c0_i32 = arith.constant 0 : i32
    %c0_i32_0 = arith.constant 0 : i32
    %c0_i32_1 = arith.constant 0 : i32
    return %c0_i32, %c0_i32_0 : i32, i32
  }
  func.func @transform_3(%arg0: i32) -> (i32, i32) {
    %c0_i32 = arith.constant 0 : i32
    %c0_i32_0 = arith.constant 0 : i32
    %c0_i32_1 = arith.constant 0 : i32
    return %c0_i32, %c0_i32_0 : i32, i32
  }
  func.func @transform_4(%arg0: i32) -> (i32, i32) {
    %c0_i32 = arith.constant 0 : i32
    %c0_i32_0 = arith.constant 0 : i32
    %c0_i32_1 = arith.constant 0 : i32
    return %c0_i32, %c0_i32_0 : i32, i32
  }
  func.func @transform_5(%arg0: i32) -> (i32, i32) {
    %c0_i32 = arith.constant 0 : i32
    %c0_i32_0 = arith.constant 0 : i32
    %c0_i32_1 = arith.constant 0 : i32
    return %c0_i32, %c0_i32_0 : i32, i32
  }
  func.func @transform_6(%arg0: i32) -> (i32, i32) {
    %c0_i32 = arith.constant 0 : i32
    %c0_i32_0 = arith.constant 0 : i32
    %c0_i32_1 = arith.constant 0 : i32
    return %c0_i32, %c0_i32_0 : i32, i32
  }
  func.func @transform_7(%arg0: i32) -> (i32, i32) {
    %c0_i32 = arith.constant 0 : i32
    %c0_i32_0 = arith.constant 0 : i32
    %c0_i32_1 = arith.constant 0 : i32
    return %c0_i32, %c0_i32_0 : i32, i32
  }
  func.func @transform_8(%arg0: i32) -> (i32, i32) {
    %c0_i32 = arith.constant 0 : i32
    %c0_i32_0 = arith.constant 0 : i32
    %c0_i32_1 = arith.constant 0 : i32
    return %c0_i32, %c0_i32_0 : i32, i32
  }
  func.func @transform_9(%arg0: i32) -> (i32, i32) {
    %c0_i32 = arith.constant 0 : i32
    %c0_i32_0 = arith.constant 0 : i32
    %c0_i32_1 = arith.constant 0 : i32
    return %c0_i32, %c0_i32_0 : i32, i32
  }
  func.func @transform_10(%arg0: i32) -> (i32, i32) {
    %c0_i32 = arith.constant 0 : i32
    %c0_i32_0 = arith.constant 0 : i32
    %c0_i32_1 = arith.constant 0 : i32
    return %c0_i32, %c0_i32_0 : i32, i32
  }
  func.func @transform_11(%arg0: i32) -> (i32, i32, i32) {
    %c0_i32 = arith.constant 0 : i32
    %c0_i32_0 = arith.constant 0 : i32
    %c0_i32_1 = arith.constant 0 : i32
    return %arg0, %c0_i32, %c0_i32_0 : i32, i32, i32
  }
}

</mosaic_0001>

<bundles_post_ra>
// kernel: dual_path_block.1
= control target key start
LH: loop header
LB: loop body
LE: loop exit
PB: predicated region body
PF: predicated region fallthrough
CT: control target
= control target key end

     0   :  { %s1367_s17 = smov 0   ;;  %s1581_s0 = inlined_call_operand.vmem [shape: f32[2,16,64], index: 0, kind: input, shape index: {}]   ;;  %s1582_s1 = inlined_call_operand.vmem [shape: f32[8,16], index: 1, kind: input, shape index: {}]   ;;  %s1583_s2 = inlined_call_operand.vmem [shape: f32[8,1], index: 2, kind: input, shape index: {}]   ;;  %s1584_s3 = inlined_call_operand.vmem [shape: f32[8,72], index: 3, kind: input, shape index: {}]   ;;  %s1585_s4 = inlined_call_operand.vmem [shape: f32[8,1], index: 4, kind: input, shape index: {}]   ;;  %s1586_s5 = inlined_call_operand.vmem [shape: f32[8,144], index: 5, kind: input, shape index: {}]   ;;  %s1587_s6 = inlined_call_operand.vmem [shape: f32[8,1], index: 6, kind: input, shape index: {}]   ;;  %s1588_s7 = inlined_call_operand.vmem [shape: f32[8,72], index: 7, kind: input, shape index: {}]   ;;  %s1589_s8 = inlined_call_operand.vmem [shape: f32[8,1], index: 8, kind: input, shape index: {}]   ;;  %s1590_s9 = inlined_call_operand.vmem [shape: f32[1,196], index: 9, kind: input, shape index: {}]   ;;  %s1591_s10 = inlined_call_operand.vmem [shape: f32[1,128], index: 10, kind: input, shape index: {}]   ;;  %s1592_s11 = inlined_call_operand.vmem [shape: f32[2,16,128], index: 11, kind: output, shape index: {}]  }
   0x1 LB: > { %s1033_s18 = sadd.s32 4294967295, %s1282_s17   ;;  %p1037_p0 = scmp.ge.s32.totalorder %s1282_s17, 1  ;;  %s1282_s17 = sphi %s1367_s17, %s21_s17  }
   0x2   : > { %p337_p1 = scmp.lt.s32.totalorder %s1282_s17, 3 }
   0x4   : > { %p338_p2 = pnand %p1037_p0, %p337_p1 }
   0x5   : > { %p377_p3 = scmp.lt.s32.totalorder (!%p338_p2), %s1033_s18, 1  ;;  %s1284_s23 = smov (!%p338_p2), 42  }
   0x6   : > { %341 = sbr.rel (%p338_p2) target bundleno = 888 (0x378), region = 64  ;;  %s1285_s24 = smov (!%p338_p2), 34  }
   0x7   : > { %s1286_s25 = smov (!%p338_p2), 50   ;;  %s1287_s26 = smov (!%p338_p2), 82  }
   0x8   : > { %s1288_s27 = smov (!%p338_p2), 58   ;;  %s1289_s28 = smov (!%p338_p2), 66  }
   0x9   : > { %s1290_s29 = smov (!%p338_p2), 90   ;;  %s1291_s30 = smov (!%p338_p2), 74  }
   0xa   : > { %s1293_s12 = smov (!%p338_p2), 94   ;;  %s1294_s13 = smov (!%p338_p2), 64  }
   0xb   : > { %s1594_s18 = smov (!%p377_p3, %s1033_s18), 1  ;;  %vm387_vm0 = vcmask 277504   ;;  %v1292_v2 = vmov 0.0   ;;  %vm485_vm1 = vcmask 15360   ;;  %vm400_vm2 = vcmask 343312   ;;  %s1295_s14 = smov 62  }
   0xc   : > { %s1049_s19 = sshll.u32 %s1594_s18, 4  ;;  %389 = vst.msk [vmem:[#allocation2 + $0x10] sm:$0xff] %vm387_vm0, %v1292_v2  ;;  %vm403_vm3 = vcmask 408912   ;;  %vm416_vm4 = vcmask 474512   ;;  %vm419_vm5 = vcmask 540112   ;;  %vm432_vm6 = vcmask 605712  }
   0xd   : > { %s381_s22 = scalar_lea.vmem %s1581_s0, %s1049_s19  ;;  %388 = vst.msk [vmem:[#allocation2] sm:$0xff] %vm387_vm0, %v1292_v2  ;;  %vm435_vm7 = vcmask 671312   ;;  %vm448_vm8 = vcmask 736912   ;;  %vm499_vm9 = vcmask 80912   ;;  %vm451_vm10 = vcmask 802512   ;;  %s1296_s15 = smov 92  }
   0xe   : > { %v407_v0 = vld [vmem:[%s381_s22 + $0x8] sm:$0xff]  ;;  %v406_v1 = vld [vmem:[%s381_s22] sm:$0xff]  ;;  %876 = vst.msk [vmem:[#allocation3] sm:$0xff] %vm387_vm0, %v1292_v2  ;;  %vm502_vm11 = vcmask 146512   ;;  %vm515_vm12 = vcmask 212112   ;;  %vm518_vm13 = vcmask 277712  }
   0xf   : > { %412 = vrot.lane.b32.xlu1 %v407_v0, %s1284_s23  ;;  %396 = vrot.lane.b32.xlu0 %v407_v0, %s1285_s24  ;;  %488 = vst.msk [vmem:[#allocation2 + $0x18] sm:$0xff] %vm485_vm1, %v1292_v2  ;;  %vm521_vm14 = vcmask 556304   ;;  %vm464_vm15 = vcmask 868112   ;;  %s1297_s16 = smov 96   ;;  %s1298_s20 = smov 124   ;;  %v528_v27 = vld [vmem:[%s1582_s1] sm:$0xff] }
  0x10   : > { %428 = vrot.lane.b32.xlu2 %v407_v0, %s1286_s25  ;;  %486 = vst.msk [vmem:[#allocation2 + $0x8] sm:$0xff] %vm485_vm1, %v1292_v2  ;;  %vm467_vm1 = vcmask 933712   ;;  %s1299_s21 = smov 126   ;;  %s1300_s22 = smov 60   ;;  %v529_v49 = vld [vmem:[%s1583_s2] sm:$0xff]  ;;  %v1301_v54 = vmov 0  }
  0x11   : > { %1153 = vset.pattern.permute.xlu2 %v1301_v54  ;;  %1152 = vset.pattern.permute.xlu1 %v1301_v54  ;;  %v826_v55 = vld [vmem:[%s1587_s6] sm:$0xff] }
  0x12   : > { %1274 = vset.pattern.permute.xlu0 %v1301_v54 }
  0x17   : > { %410 = vrot.lane.b32.xlu1 %v406_v1, %s1284_s23  ;;  %394 = vrot.lane.b32.xlu0 %v406_v1, %s1285_s24  ;;  %s1304_s23 = smov 110  }
  0x18   : > { %426 = vrot.lane.b32.xlu2 %v406_v1, %s1286_s25  ;;  %s1305_s25 = smov 127  }
  0x1f   : > { %495 = vrot.lane.b32.xlu1 %v407_v0, %s1287_s26  ;;  %444 = vrot.lane.b32.xlu0 %v407_v0, %s1288_s27 }
  0x20   : > { %442 = vrot.lane.b32.xlu2 %v406_v1, %s1288_s27 }
  0x27   : > { %493 = vrot.lane.b32.xlu1 %v406_v1, %s1287_s26  ;;  %460 = vrot.lane.b32.xlu0 %v407_v0, %s1289_s28 }
  0x28   : > { %511 = vrot.lane.b32.xlu2 %v407_v0, %s1290_s29 }
  0x2f   : > { %476 = vrot.lane.b32.xlu1 %v407_v0, %s1291_s30  ;;  %458 = vrot.lane.b32.xlu0 %v406_v1, %s1289_s28  ;;  %s1306_s28 = smov 112  }
  0x30   : > { %509 = vrot.lane.b32.xlu2 %v406_v1, %s1290_s29  ;;  %s1302_s29 = smov 95  }
  0x37   : > { %474 = vrot.lane.b32.xlu0 %v406_v1, %s1291_s30  ;;  %s1303_s30 = smov 111  }
  0x6a   : > { %v429_v3 = vpop.permute.xlu2 %428 }
  0x72   : > { %v427_v4 = vpop.permute.xlu2 %426 }
  0x7a   : > { %v443_v7 = vpop.permute.xlu2 %442 }
  0x81   : > { %v413_v5 = vpop.permute.xlu1 %412  ;;  %v397_v6 = vpop.permute.xlu0 %396 }
  0x82   : > { %402 = vst.msk [vmem:[#allocation2 + $0x10] sm:$0xff] %vm400_vm2, %v397_v6  ;;  %v512_v10 = vpop.permute.xlu2 %511 }
  0x83   : > { %405 = vst.msk [vmem:[#allocation2 + $0x10] sm:$0xff] %vm403_vm3, %v1292_v2 }
  0x84   : > { %418 = vst.msk [vmem:[#allocation2 + $0x10] sm:$0xff] %vm416_vm4, %v413_v5 }
  0x85   : > { %421 = vst.msk [vmem:[#allocation2 + $0x10] sm:$0xff] %vm419_vm5, %v1292_v2 }
  0x86   : > { %434 = vst.msk [vmem:[#allocation2 + $0x10] sm:$0xff] %vm432_vm6, %v429_v3 }
  0x87   : > { %437 = vst.msk [vmem:[#allocation2 + $0x10] sm:$0xff] %vm435_vm7, %v1292_v2 }
  0x89   : > { %v411_v8 = vpop.permute.xlu1 %410  ;;  %v395_v9 = vpop.permute.xlu0 %394 }
  0x8a   : > { %401 = vst.msk [vmem:[#allocation2] sm:$0xff] %vm400_vm2, %v395_v9  ;;  %v510_v15 = vpop.permute.xlu2 %509  ;;  %vm480_vm2 = vcmask 999312  }
  0x8b   : > { %404 = vst.msk [vmem:[#allocation2] sm:$0xff] %vm403_vm3, %v1292_v2  ;;  %vm483_vm3 = vcmask 1048528  }
  0x8c   : > { %417 = vst.msk [vmem:[#allocation2] sm:$0xff] %vm416_vm4, %v411_v8  ;;  %vm535_vm4 = vcmask 130048  }
  0x8d   : > { %420 = vst.msk [vmem:[#allocation2] sm:$0xff] %vm419_vm5, %v1292_v2  ;;  %vm806_vm5 = vcmask 506880  }
  0x8e   : > { %433 = vst.msk [vmem:[#allocation2] sm:$0xff] %vm432_vm6, %v427_v4  ;;  %vm793_vm6 = vcmask 523264  }
  0x8f   : > { %436 = vst.msk [vmem:[#allocation2] sm:$0xff] %vm435_vm7, %v1292_v2  ;;  %vm780_vm7 = vcmask 752640  }
  0x90   : > { %449 = vst.msk [vmem:[#allocation2] sm:$0xff] %vm448_vm8, %v443_v7 }
  0x91   : > { %v496_v11 = vpop.permute.xlu1 %495  ;;  %v445_v12 = vpop.permute.xlu0 %444  ;;  %452 = vst.msk [vmem:[#allocation2] sm:$0xff] %vm451_vm10, %v1292_v2 }
  0x92   : > { %501 = vst.msk [vmem:[#allocation2 + $0x18] sm:$0xff] %vm499_vm9, %v496_v11 }
  0x93   : > { %450 = vst.msk [vmem:[#allocation2 + $0x10] sm:$0xff] %vm448_vm8, %v445_v12  ;;  %vm637_vm8 = vcmask 769024  }
  0x94   : > { %504 = vst.msk [vmem:[#allocation2 + $0x18] sm:$0xff] %vm502_vm11, %v1292_v2 }
  0x95   : > { %517 = vst.msk [vmem:[#allocation2 + $0x18] sm:$0xff] %vm515_vm12, %v512_v10 }
  0x96   : > { %520 = vst.msk [vmem:[#allocation2 + $0x18] sm:$0xff] %vm518_vm13, %v1292_v2 }
  0x97   : > { %523 = vst.msk [vmem:[#allocation2 + $0x18] sm:$0xff] %vm521_vm14, %v1292_v2 }
  0x98   : > { %453 = vst.msk [vmem:[#allocation2 + $0x10] sm:$0xff] %vm451_vm10, %v1292_v2  ;;  %vm625_vm10 = vcmask 785408  }
  0x99   : > { %v494_v13 = vpop.permute.xlu1 %493  ;;  %v461_v14 = vpop.permute.xlu0 %460 }
  0x9a   : > { %500 = vst.msk [vmem:[#allocation2 + $0x8] sm:$0xff] %vm499_vm9, %v494_v13  ;;  %vm819_vm9 = vcmask 490496  }
  0x9b   : > { %503 = vst.msk [vmem:[#allocation2 + $0x8] sm:$0xff] %vm502_vm11, %v1292_v2  ;;  %vm743_vm11 = vcmask 1014784  }
  0x9c   : > { %466 = vst.msk [vmem:[#allocation2 + $0x10] sm:$0xff] %vm464_vm15, %v461_v14 }
  0x9d   : > { %516 = vst.msk [vmem:[#allocation2 + $0x8] sm:$0xff] %vm515_vm12, %v510_v15  ;;  %vm601_vm12 = vcmask 1031168  }
  0x9e   : > { %519 = vst.msk [vmem:[#allocation2 + $0x8] sm:$0xff] %vm518_vm13, %v1292_v2  ;;  %v527_v16 = vld [vmem:[#allocation2 + $0x18] sm:$0xff]  ;;  %vm631_vm13 = vcmask 777216  }
  0x9f   : > { %522 = vst.msk [vmem:[#allocation2 + $0x8] sm:$0xff] %vm521_vm14, %v1292_v2  ;;  %766 = vrot.lane.b32.xlu2 %v527_v16, %s1293_s12  ;;  %573 = vmatpush.msra.mxu1 %v527_v16 }
  0xa0   : > { %469 = vst.msk [vmem:[#allocation2 + $0x10] sm:$0xff] %vm467_vm1, %v1292_v2 }
  0xa1   : > { %v477_v17 = vpop.permute.xlu1 %476  ;;  %v459_v18 = vpop.permute.xlu0 %458 }
  0xa2   : > { %482 = vst.msk [vmem:[#allocation2 + $0x10] sm:$0xff] %vm480_vm2, %v477_v17 }
  0xa3   : > { %487 = vst.msk [vmem:[#allocation2 + $0x10] sm:$0xff] %vm483_vm3, %v1292_v2 }
  0xa4   : > { %465 = vst.msk [vmem:[#allocation2] sm:$0xff] %vm464_vm15, %v459_v18  ;;  %vm619_vm15 = vcmask 900096  }
  0xa5   : > { %468 = vst.msk [vmem:[#allocation2] sm:$0xff] %vm467_vm1, %v1292_v2  ;;  %vm886_vm1 = vcmask 1047824  }
  0xa6   : > { %v525_v19 = vld [vmem:[#allocation2 + $0x8] sm:$0xff] }
  0xa7   : > { %762 = vrot.lane.b32.xlu1 %v525_v19, %s1293_s12  ;;  %574 = vmatpush.msra.mxu1 %v525_v19 }
  0xa8   : > { %1043 = vmatmul.msk.f32.vlgmr.msra.gmra.mxu1 %vm535_vm4, %v528_v27 }
  0xa9   : > { %v475_v20 = vpop.permute.xlu0 %474 }
  0xaa   : > { %481 = vst.msk [vmem:[#allocation2] sm:$0xff] %vm480_vm2, %v475_v20  ;;  %v1430_v21 = vld [vmem:[#allocation2 + $0x10] sm:$0xff]  ;;  %vm595_vm2 = vcmask 1039360  }
  0xab   : > { %484 = vst.msk [vmem:[#allocation2] sm:$0xff] %vm483_vm3, %v1292_v2  ;;  %v1092_v22 = vpack.i.bf16 %v527_v16, %v1430_v21  ;;  %553 = vmatpush.msra.mxu0 %v1430_v21  ;;  %vm695_vm3 = vcmask 588800  }
  0xad   : > { %1093 = vrot.lane.b32.xlu0 %v1092_v22, %s1294_s13 }
  0xaf   : > { %1083 = vrot.lane.b32.xlu1 %v1092_v22, %s1295_s14 }
  0xb2   : > { %v1437_v23 = vld [vmem:[#allocation2] sm:$0xff] }
  0xb3   : > { %v1107_v24 = vpack.i.bf16 %v525_v19, %v1437_v23  ;;  %554 = vmatpush.msra.mxu0 %v1437_v23 }
  0xb4   : > { %1042 = vmatmul.msk.f32.vlgmr.msra.gmra.mxu0 %vm535_vm4, %v528_v27  ;;  %v824_v27 = vld [vmem:[%s1586_s5] sm:$0xff] }
  0xb5   : > { %1108 = vrot.lane.b32.xlu0 %v1107_v24, %s1296_s15  ;;  %1088 = vrot.lane.b32.xlu2 %v1107_v24, %s1295_s14 }
  0xb7   : > { %1098 = vrot.lane.b32.xlu1 %v1107_v24, %s1294_s13 }
  0xbd   : > { %760 = vrot.lane.b32.xlu0 %v1437_v23, %s1293_s12  ;;  %1103 = vrot.lane.b32.xlu2 %v1092_v22, %s1296_s15 }
  0xbf   : > { %764 = vrot.lane.b32.xlu1 %v1430_v21, %s1293_s12 }
  0xc5   : > { %1118 = vrot.lane.b32.xlu0 %v1107_v24, %s1297_s16  ;;  %1113 = vrot.lane.b32.xlu2 %v1092_v22, %s1297_s16 }
  0xc7   : > { %1123 = vrot.lane.b32.xlu1 %v1092_v22, %s1298_s20 }
  0xcd   : > { %1133 = vrot.lane.b32.xlu0 %v1092_v22, %s1299_s21  ;;  %1128 = vrot.lane.b32.xlu2 %v1107_v24, %s1298_s20 }
  0xcf   : > { %1138 = vrot.lane.b32.xlu1 %v1107_v24, %s1299_s21 }
  0xd5   : > { %1148 = vrot.lane.b32.xlu0 %v1107_v24, %s1300_s22  ;;  %1143 = vrot.lane.b32.xlu2 %v1092_v22, %s1300_s22 }
  0xd7   : > { %829 = vperm.xlu1 %1152, %v826_v55  }
  0xdd   : > { %532 = vperm.xlu2 %1153, %v529_v49  }
  0xf9   : > { %v767_v25 = vpop.permute.xlu2 %766 }
 0x10f   : > { %v1089_v26 = vpop.permute.xlu2 %1088 }
 0x110   : > { %v1091_v32 = vunpack.i.h.bf16 %v1089_v26  ;;  %v1090_v33 = vunpack.i.l.bf16 %v1089_v26 }
 0x112   : > { %v807_v40 = vsel %vm806_vm5, %v1090_v33, %v1091_v32 }
 0x117   : > { %v1104_v28 = vpop.permute.xlu2 %1103 }
 0x118   : > { %v1106_v44 = vunpack.i.h.bf16 %v1104_v28  ;;  %v1105_v45 = vunpack.i.l.bf16 %v1104_v28 }
 0x119   : > { %v763_v29 = vpop.permute.xlu1 %762 }
 0x11a   : > { %v782_v53 = vsel %vm780_vm7, %v1105_v45, %v1106_v44 }
 0x11f   : > { %v1094_v30 = vpop.permute.xlu0 %1093  ;;  %v1114_v31 = vpop.permute.xlu2 %1113 }
 0x120   : > { %v1096_v37 = vunpack.i.h.bf16 %v1094_v30  ;;  %v1095_v38 = vunpack.i.l.bf16 %v1094_v30  ;;  %v1116_v57 = vunpack.i.h.bf16 %v1114_v31  ;;  %v1115_v60 = vunpack.i.l.bf16 %v1114_v31  ;;  %v825_v30 = vld [vmem:[%s1586_s5 + $0x8] sm:$0xff] }
 0x121   : > { %v1084_v34 = vpop.permute.xlu1 %1083 }
 0x122   : > { %v1086_v35 = vunpack.i.h.bf16 %v1084_v34  ;;  %v1085_v36 = vunpack.i.l.bf16 %v1084_v34  ;;  %v795_v43 = vsel %vm793_vm6, %v1095_v38, %v1096_v37  ;;  %v757_v4 = vsel %vm625_vm10, %v1115_v60, %v1116_v57 }
 0x124   : > { %v808_v39 = vsel %vm806_vm5, %v1085_v36, %v1086_v35 }
 0x125   : > { %835 = vmatpush.msra.mxu3 %v808_v39  ;;  %v576_v33 = vpop.f32.mrf.mxu1 }
 0x127   : > { %836 = vmatpush.msra.mxu3 %v807_v40  ;;  %v1109_v41 = vpop.permute.xlu0 %1108  ;;  %v1129_v42 = vpop.permute.xlu2 %1128 }
 0x128   : > { %v1111_v50 = vunpack.i.h.bf16 %v1109_v41  ;;  %v1110_v51 = vunpack.i.l.bf16 %v1109_v41  ;;  %v1131_v8 = vunpack.i.h.bf16 %v1129_v42  ;;  %v1130_v9 = vunpack.i.l.bf16 %v1129_v42 }
 0x129   : > { %v1099_v46 = vpop.permute.xlu1 %1098  ;;  %837 = vmatpush.msra.mxu3 %v795_v43 }
 0x12a   : > { %v1101_v47 = vunpack.i.h.bf16 %v1099_v46  ;;  %v1100_v48 = vunpack.i.l.bf16 %v1099_v46  ;;  %v781_v59 = vsel %vm780_vm7, %v1110_v51, %v1111_v50  ;;  %v744_v15 = vsel %vm743_vm11, %v1130_v9, %v1131_v8 }
 0x12c   : > { %v794_v52 = vsel %vm793_vm6, %v1100_v48, %v1101_v47  ;;  %v1275_v48 = vld [vmem:[%s1591_s10] ss:$0 sm:$0xff] }
 0x12d   : > { %838 = vmatpush.msra.mxu3 %v794_v52 }
 0x12f   : > { %839 = vmatpush.msra.mxu3 %v782_v53  ;;  %v761_v56 = vpop.permute.xlu0 %760  ;;  %v1144_v58 = vpop.permute.xlu2 %1143 }
 0x130   : > { %v1146_v61 = vunpack.i.h.bf16 %v1144_v58  ;;  %v1145_v62 = vunpack.i.l.bf16 %v1144_v58  ;;  %v1480_v3 = vsel %vm637_vm8, %v761_v56, %v763_v29 }
 0x131   : > { %v765_v63 = vpop.permute.xlu1 %764  ;;  %840 = vmatpush.msra.mxu3 %v781_v59  ;;  %v556_v34 = vpop.f32.mrf.mxu0 }
 0x132   : > { %v1475_v0 = vsel %vm637_vm8, %v765_v63, %v767_v25  ;;  %v821_v1 = vsel %vm819_vm9, %v1145_v62, %v1146_v61 }
 0x133   : > { %841 = vmatpush.msra.mxu3 %v1475_v0  ;;  %869 = vmatpush.msrb.mxu0 %v821_v1 }
 0x135   : > { %842 = vmatpush.msra.mxu3 %v1480_v3 }
 0x137   : > { %v1119_v5 = vpop.permute.xlu0 %1118  ;;  %843 = vmatpush.msra.mxu3 %v757_v4  ;;  %v533_v32 = vpop.permute.xlu2 %532 }
 0x138   : > { %v1121_v6 = vunpack.i.h.bf16 %v1119_v5  ;;  %v1120_v7 = vunpack.i.l.bf16 %v1119_v5  ;;  %v577_v36 = vadd.f32 %v576_v33, %v533_v32 }
 0x139   : > { %v1124_v10 = vpop.permute.xlu1 %1123 }
 0x13a   : > { %v1126_v11 = vunpack.i.h.bf16 %v1124_v10  ;;  %v1125_v12 = vunpack.i.l.bf16 %v1124_v10  ;;  %v756_v13 = vsel %vm625_vm10, %v1120_v7, %v1121_v6  ;;  %v580_v38 = vmax.f32 %v577_v36, 0.0 }
 0x13b   : > { %844 = vmatpush.msra.mxu3 %v756_v13 }
 0x13c   : > { %v745_v14 = vsel %vm743_vm11, %v1125_v12, %v1126_v11 }
 0x13d   : > { %845 = vmatpush.msra.mxu3 %v745_v14 }
 0x13f   : > { %v1134_v16 = vpop.permute.xlu0 %1133  ;;  %846 = vmatpush.msra.mxu3 %v744_v15 }
 0x140   : > { %v1136_v17 = vunpack.i.h.bf16 %v1134_v16  ;;  %v1135_v18 = vunpack.i.l.bf16 %v1134_v16 }
 0x141   : > { %v1139_v19 = vpop.permute.xlu1 %1138 }
 0x142   : > { %v1141_v20 = vunpack.i.h.bf16 %v1139_v19  ;;  %v1140_v22 = vunpack.i.l.bf16 %v1139_v19  ;;  %v732_v24 = vsel %vm601_vm12, %v1135_v18, %v1136_v17 }
 0x143   : > { %847 = vmatpush.msra.mxu3 %v732_v24 }
 0x144   : > { %v731_v25 = vsel %vm601_vm12, %v1140_v22, %v1141_v20 }
 0x145   : > { %848 = vmatpush.msra.mxu3 %v731_v25 }
 0x147   : > { %849 = vmatpush.msra.mxu3 %v1430_v21  ;;  %v1149_v26 = vpop.permute.xlu0 %1148  ;;  %v581_v21 = vld [vmem:[%s1590_s9] sm:$0x3] }
 0x148   : > { %v1151_v28 = vunpack.i.h.bf16 %v1149_v26  ;;  %v1150_v29 = vunpack.i.l.bf16 %v1149_v26  ;;  %v584_v35 = vperm.slane %v581_v21, 1  ;;  %v583_v37 = vperm.slane %v581_v21, 0 }
 0x149   : > { %850 = vmatpush.msra.mxu3 %v1437_v23  ;;  %v557_v23 = vadd.f32 %v556_v34, %v533_v32  ;;  %v830_v43 = vpop.permute.xlu1 %829  ;;  %v640_v34 = vld [vmem:[%s1585_s4] sm:$0xff] }
 0x14a   : > { %851 = vmatmul.f32.vlgmr.msra.gmra.mxu3 %v824_v27  ;;  %v820_v31 = vsel %vm819_vm9, %v1150_v29, %v1151_v28  ;;  %v588_v40 = vmul.f32 %v584_v35, %v580_v38  ;;  %v943_v35 = vld [vmem:[%s1589_s8] sm:$0xff] }
 0x14b   : > { %870 = vmatpush.msrb.mxu0 %v820_v31  ;;  %v579_v39 = vmax.f32 %v557_v23, 0.0 }
 0x14c   : > { %1045 = vmatmul.msk.f32.vlgmr.msrb.gmra.mxu0 %vm535_vm4, %v825_v30 }
 0x14d   : > { %v587_v41 = vmul.f32 %v583_v37, %v579_v39 }
 0x14f   : > { %v1154_v42 = vpack.i.bf16 %v588_v40, %v587_v41 }
 0x151   : > { %1155 = vrot.lane.b32.xlu1 %v1154_v42, %s1293_s12  ;;  %1160 = vrot.lane.b32.xlu2 %v1154_v42, %s1302_s29 }
 0x159   : > { %1175 = vrot.lane.b32.xlu2 %v1154_v42, %s1303_s30  ;;  %1170 = vrot.lane.b32.xlu1 %v1154_v42, %s1304_s23 }
 0x161   : > { %1190 = vrot.lane.b32.xlu2 %v1154_v42, %s1305_s25  ;;  %1185 = vrot.lane.b32.xlu1 %v1154_v42, %s1299_s21 }
 0x1ab   : > { %v1161_v51 = vpop.permute.xlu2 %1160 }
 0x1ac   : > { %v1163_v52 = vunpack.i.h.bf16 %v1161_v51  ;;  %v1162_v53 = vunpack.i.l.bf16 %v1161_v51 }
 0x1ae   : > { %v632_v54 = vsel %vm631_vm13, %v1162_v53, %v1163_v52 }
 0x1af   : > { %v1199_v55 = vpack.i.bf16 %v1163_v52, %v632_v54 }
 0x1b1   : > { %1200 = vrot.lane.b32.xlu1 %v1199_v55, %s1303_s30 }
 0x1b3   : > { %v1176_v11 = vpop.permute.xlu2 %1175 }
 0x1b4   : > { %v1178_v20 = vunpack.i.h.bf16 %v1176_v11  ;;  %v1177_v22 = vunpack.i.l.bf16 %v1176_v11 }
 0x1bb   : > { %v1191_v27 = vpop.permute.xlu2 %1190 }
 0x1bc   : > { %v1193_v31 = vunpack.i.h.bf16 %v1191_v27  ;;  %v1192_v21 = vunpack.i.l.bf16 %v1191_v27 }
 0x1be   : > { %v596_v32 = vsel %vm595_vm2, %v1192_v21, %v1193_v31 }
 0x1bf   : > { %v1229_v33 = vpack.i.bf16 %v1193_v31, %v596_v32 }
 0x1c3   : > { %v1156_v56 = vpop.permute.xlu1 %1155 }
 0x1c4   : > { %v1158_v57 = vunpack.i.h.bf16 %v1156_v56  ;;  %v1157_v58 = vunpack.i.l.bf16 %v1156_v56 }
 0x1c6   : > { %v638_v59 = vsel %vm637_vm8, %v1157_v58, %v1158_v57 }
 0x1c7   : > { %v1194_v60 = vpack.i.bf16 %v1158_v57, %v638_v59 }
 0x1c9   : > { %v872_v45 = vpop.f32.mrf.mxu0 }
 0x1cb   : > { %v1171_v61 = vpop.permute.xlu1 %1170 }
 0x1cc   : > { %v1173_v62 = vunpack.i.h.bf16 %v1171_v61  ;;  %v1172_v63 = vunpack.i.l.bf16 %v1171_v61 }
 0x1cd   : > { %v852_v44 = vpop.f32.mrf.mxu3 }
 0x1ce   : > { %v853_v46 = vadd.f32 %v852_v44, %v830_v43  ;;  %v620_v1 = vsel %vm619_vm15, %v1172_v63, %v1173_v62 }
 0x1cf   : > { %v1209_v4 = vpack.i.bf16 %v1173_v62, %v620_v1 }
 0x1d0   : > { %v873_v47 = vadd.f32 %v872_v45, %v853_v46 }
 0x1d2   : > { %v875_v49 = vmax.f32 %v873_v47, 0.0 }
 0x1d3   : > { %v1186_v5 = vpop.permute.xlu1 %1185 }
 0x1d4   : > { %v881_v50 = vmul.f32 %v1275_v48, %v875_v49  ;;  %v1188_v6 = vunpack.i.h.bf16 %v1186_v5  ;;  %v1187_v7 = vunpack.i.l.bf16 %v1186_v5 }
 0x1d6   : > { %883 = vrot.lane.b32.xlu0 %v881_v50, %s1285_s24  ;;  %v602_v8 = vsel %vm601_vm12, %v1187_v7, %v1188_v6 }
 0x1d7   : > { %v1224_v9 = vpack.i.bf16 %v1188_v6, %v602_v8 }
 0x1de   : > { %1165 = vrot.lane.b32.xlu0 %v1154_v42, %s1297_s16 }
 0x1e6   : > { %1180 = vrot.lane.b32.xlu0 %v1154_v42, %s1306_s28 }
 0x1ee   : > { %1195 = vrot.lane.b32.xlu0 %v1194_v60, %s1303_s30 }
 0x1f6   : > { %1210 = vrot.lane.b32.xlu0 %v1209_v4, %s1303_s30 }
 0x1fe   : > { %1225 = vrot.lane.b32.xlu0 %v1224_v9, %s1303_s30  ;;  %v639_v9 = vld [vmem:[%s1584_s3] sm:$0xff] }
 0x223   : > { %v1201_v36 = vpop.permute.xlu1 %1200 }
 0x224   : > { %v1203_v23 = vunpack.i.h.bf16 %v1201_v36  ;;  %v1202_v37 = vunpack.i.l.bf16 %v1201_v36 }
 0x248   : > { %v884_v10 = vpop.permute.xlu0 %883 }
 0x249   : > { %887 = vst.msk [vmem:[#allocation3] sm:$0xff] %vm886_vm1, %v884_v10 }
 0x24a   : > { %888 = vst.msk [vmem:[#allocation3 + $0x8] sm:$0xff] %vm387_vm0, %v884_v10  ;;  %vm613_vm0 = vcmask 908288  }
 0x24b   : > { %889 = vst.msk [vmem:[#allocation3 + $0x8] sm:$0xff] %vm521_vm14, %v1292_v2  ;;  %vm607_vm14 = vcmask 916480   ;;  %v1526_v24 = vsel %vm613_vm0, %v1177_v22, %v1178_v20  ;;  %v684_v42 = vsel %vm613_vm0, %v1202_v37, %v1203_v23 }
 0x24c   : > { %v1214_v29 = vpack.i.bf16 %v1178_v20, %v1526_v24 }
 0x250   : > { %v1166_v12 = vpop.permute.xlu0 %1165  ;;  %v1519_v13 = vld [vmem:[#allocation3] sm:$0xff] }
 0x251   : > { %v1168_v14 = vunpack.i.h.bf16 %v1166_v12  ;;  %v1167_v15 = vunpack.i.l.bf16 %v1166_v12 }
 0x252   : > { %v891_v16 = vld [vmem:[#allocation3 + $0x8] sm:$0xff] }
 0x253   : > { %v626_v17 = vsel %vm625_vm10, %v1167_v15, %v1168_v14  ;;  %v1239_v18 = vpack.i.bf16 %v891_v16, %v1519_v13 }
 0x254   : > { %v1204_v19 = vpack.i.bf16 %v1168_v14, %v626_v17 }
 0x255   : > { %1240 = vrot.lane.b32.xlu0 %v1239_v18, %s1295_s14 }
 0x256   : > { %1205 = vrot.lane.b32.xlu2 %v1204_v19, %s1303_s30 }
 0x258   : > { %v1181_v2 = vpop.permute.xlu0 %1180 }
 0x259   : > { %v1183_v25 = vunpack.i.h.bf16 %v1181_v2  ;;  %v1182_v26 = vunpack.i.l.bf16 %v1181_v2 }
 0x25b   : > { %v608_v28 = vsel %vm607_vm14, %v1182_v26, %v1183_v25 }
 0x25c   : > { %v1219_v30 = vpack.i.bf16 %v1183_v25, %v608_v28 }
 0x25d   : > { %1255 = vrot.lane.b32.xlu0 %v1239_v18, %s1293_s12 }
 0x25e   : > { %1220 = vrot.lane.b32.xlu1 %v1219_v30, %s1303_s30  ;;  %1215 = vrot.lane.b32.xlu2 %v1214_v29, %s1303_s30 }
 0x260   : > { %v1196_v38 = vpop.permute.xlu0 %1195 }
 0x261   : > { %v1198_v39 = vunpack.i.h.bf16 %v1196_v38  ;;  %v1197_v40 = vunpack.i.l.bf16 %v1196_v38 }
 0x263   : > { %v685_v41 = vsel %vm613_vm0, %v1197_v40, %v1198_v39  ;;  %v942_v39 = vld [vmem:[%s1588_s7] sm:$0xff] }
 0x264   : > { %706 = vmatpush.msra.mxu2 %v685_v41 }
 0x265   : > { %1270 = vrot.lane.b32.xlu0 %v1239_v18, %s1299_s21 }
 0x266   : > { %1235 = vrot.lane.b32.xlu1 %v1239_v18, %s1300_s22  ;;  %1230 = vrot.lane.b32.xlu2 %v1229_v33, %s1303_s30  ;;  %s386_s30 = scalar_lea.vmem %s1592_s11, %s1049_s19 }
 0x267   : > { %707 = vmatpush.msra.mxu2 %v684_v42 }
 0x268   : > { %v1211_v43 = vpop.permute.xlu0 %1210 }
 0x269   : > { %v1213_v44 = vunpack.i.h.bf16 %v1211_v43  ;;  %v1212_v45 = vunpack.i.l.bf16 %v1211_v43 }
 0x26b   : > { %v682_v50 = vsel %vm613_vm0, %v1212_v45, %v1213_v44 }
 0x26e   : > { %1250 = vrot.lane.b32.xlu1 %v1239_v18, %s1296_s15  ;;  %1245 = vrot.lane.b32.xlu2 %v1239_v18, %s1294_s13 }
 0x270   : > { %v1226_v55 = vpop.permute.xlu0 %1225 }
 0x271   : > { %v1228_v58 = vunpack.i.h.bf16 %v1226_v55  ;;  %v1227_v59 = vunpack.i.l.bf16 %v1226_v55 }
 0x273   : > { %v679_v5 = vsel %vm613_vm0, %v1227_v59, %v1228_v58 }
 0x276   : > { %1260 = vrot.lane.b32.xlu1 %v1239_v18, %s1297_s16  ;;  %1265 = vrot.lane.b32.xlu2 %v1239_v18, %s1298_s20 }
 0x27e   : > { %643 = vperm.xlu1 %1152, %v640_v34   ;;  %946 = vperm.xlu2 %1153, %v943_v35  }
 0x2b0   : > { %v1206_v46 = vpop.permute.xlu2 %1205 }
 0x2b1   : > { %v1208_v47 = vunpack.i.h.bf16 %v1206_v46  ;;  %v1207_v48 = vunpack.i.l.bf16 %v1206_v46 }
 0x2b3   : > { %v683_v49 = vsel %vm613_vm0, %v1207_v48, %v1208_v47 }
 0x2b4   : > { %708 = vmatpush.msra.mxu2 %v683_v49 }
 0x2b6   : > { %709 = vmatpush.msra.mxu2 %v682_v50 }
 0x2b8   : > { %v1216_v51 = vpop.permute.xlu2 %1215 }
 0x2b9   : > { %v1218_v52 = vunpack.i.h.bf16 %v1216_v51  ;;  %v1217_v53 = vunpack.i.l.bf16 %v1216_v51 }
 0x2bb   : > { %v681_v54 = vsel %vm613_vm0, %v1217_v53, %v1218_v52 }
 0x2bc   : > { %710 = vmatpush.msra.mxu2 %v681_v54 }
 0x2c0   : > { %v1231_v56 = vpop.permute.xlu2 %1230 }
 0x2c1   : > { %v1233_v62 = vunpack.i.h.bf16 %v1231_v56  ;;  %v1232_v63 = vunpack.i.l.bf16 %v1231_v56 }
 0x2c3   : > { %v678_v6 = vsel %vm613_vm0, %v1232_v63, %v1233_v62 }
 0x2c7   : > { %v1241_v4 = vpop.permute.xlu0 %1240 }
 0x2c8   : > { %v1246_v7 = vpop.permute.xlu2 %1245  ;;  %v1243_v10 = vunpack.i.h.bf16 %v1241_v4  ;;  %v1242_v11 = vunpack.i.l.bf16 %v1241_v4 }
 0x2c9   : > { %v1248_v15 = vunpack.i.h.bf16 %v1246_v7  ;;  %v1247_v16 = vunpack.i.l.bf16 %v1246_v7 }
 0x2ca   : > { %v934_v18 = vsel %vm806_vm5, %v1242_v11, %v1243_v10 }
 0x2cb   : > { %v928_v20 = vsel %vm793_vm6, %v1247_v16, %v1248_v15 }
 0x2cf   : > { %v1256_v19 = vpop.permute.xlu0 %1255 }
 0x2d0   : > { %v1221_v57 = vpop.permute.xlu1 %1220  ;;  %v1258_v2 = vunpack.i.h.bf16 %v1256_v19  ;;  %v1257_v25 = vunpack.i.l.bf16 %v1256_v19  ;;  %v1266_v29 = vpop.permute.xlu2 %1265 }
 0x2d1   : > { %v1223_v60 = vunpack.i.h.bf16 %v1221_v57  ;;  %v1222_v61 = vunpack.i.l.bf16 %v1221_v57  ;;  %v1268_v21 = vunpack.i.h.bf16 %v1266_v29  ;;  %v1267_v32 = vunpack.i.l.bf16 %v1266_v29 }
 0x2d2   : > { %v916_v28 = vsel %vm637_vm8, %v1257_v25, %v1258_v2 }
 0x2d3   : > { %v680_v1 = vsel %vm613_vm0, %v1222_v61, %v1223_v60  ;;  %v904_v37 = vsel %vm743_vm11, %v1267_v32, %v1268_v21 }
 0x2d4   : > { %711 = vmatpush.msra.mxu2 %v680_v1 }
 0x2d6   : > { %712 = vmatpush.msra.mxu2 %v679_v5 }
 0x2d7   : > { %v1271_v30 = vpop.permute.xlu0 %1270 }
 0x2d8   : > { %v1236_v8 = vpop.permute.xlu1 %1235  ;;  %713 = vmatpush.msra.mxu2 %v678_v6  ;;  %v1273_v35 = vunpack.i.h.bf16 %v1271_v30  ;;  %v1272_v36 = vunpack.i.l.bf16 %v1271_v30  ;;  %v947_v45 = vpop.permute.xlu2 %946 }
 0x2d9   : > { %v1238_v12 = vunpack.i.h.bf16 %v1236_v8  ;;  %v1237_v14 = vunpack.i.l.bf16 %v1236_v8 }
 0x2da   : > { %714 = vmatpush.msra.mxu2 %v1526_v24  ;;  %v898_v38 = vsel %vm601_vm12, %v1272_v36, %v1273_v35 }
 0x2db   : > { %1044 = vmatmul.msk.f32.vlgmr.msra.gmra.mxu2 %vm695_vm3, %v639_v9  ;;  %v940_v17 = vsel %vm819_vm9, %v1237_v14, %v1238_v12 }
 0x2dc   : > { %959 = vmatpush.msrb.mxu1 %v940_v17 }
 0x2de   : > { %960 = vmatpush.msrb.mxu1 %v934_v18 }
 0x2e0   : > { %v1251_v22 = vpop.permute.xlu1 %1250  ;;  %961 = vmatpush.msrb.mxu1 %v928_v20 }
 0x2e1   : > { %v1253_v26 = vunpack.i.h.bf16 %v1251_v22  ;;  %v1252_v27 = vunpack.i.l.bf16 %v1251_v22 }
 0x2e3   : > { %v922_v24 = vsel %vm780_vm7, %v1252_v27, %v1253_v26 }
 0x2e4   : > { %962 = vmatpush.msrb.mxu1 %v922_v24 }
 0x2e6   : > { %963 = vmatpush.msrb.mxu1 %v916_v28 }
 0x2e8   : > { %v1261_v31 = vpop.permute.xlu1 %1260 }
 0x2e9   : > { %v1263_v33 = vunpack.i.h.bf16 %v1261_v31  ;;  %v1262_v34 = vunpack.i.l.bf16 %v1261_v31 }
 0x2eb   : > { %v910_v23 = vsel %vm625_vm10, %v1262_v34, %v1263_v33 }
 0x2ec   : > { %964 = vmatpush.msrb.mxu1 %v910_v23 }
 0x2ee   : > { %965 = vmatpush.msrb.mxu1 %v904_v37 }
 0x2f0   : > { %966 = vmatpush.msrb.mxu1 %v898_v38  ;;  %v644_v40 = vpop.permute.xlu1 %643 }
 0x2f2   : > { %967 = vmatpush.msrb.mxu1 %v1519_v13 }
 0x2f3   : > { %1046 = vmatmul.msk.f32.vlgmr.msrb.gmra.mxu1 %vm695_vm3, %v942_v39 }
 0x35e   : > { %v716_v41 = vpop.f32.mrf.mxu2 }
 0x35f   : > { %v717_v42 = vadd.f32 %v716_v41, %v644_v40 }
 0x361   : > { %v972_v43 = vadd.f32 %v1480_v3, %v717_v42 }
 0x363   : > { %v974_v44 = vmax.f32 %v972_v43, 0.0 }
 0x365   : > { %976 = vst [vmem:[%s386_s30] sm:$0xff] %v974_v44 }
 0x370   : > { %v969_v46 = vpop.f32.mrf.mxu1 }
 0x371   : > { %v970_v47 = vadd.f32 %v969_v46, %v947_v45 }
 0x373   : > { %v973_v48 = vadd.f32 %v970_v47, %v1475_v0 }
 0x375   : > { %v975_v13 = vmax.f32 %v973_v48, 0.0 }
 0x377   : > { %977 = vst [vmem:[%s386_s30 + $0x8] sm:$0xff] %v975_v13 }
 0x378 PF: > { %s21_s17 = sadd.s32 1, %s1282_s17  }
 0x379   : > { %p18_p4 = scmp.ge.s32.totalorder %s21_s17, 4  }
 0x37b   :  { %20 = sbr.rel (!%p18_p4) target bundleno = 1 (0x1), region = 94 }

</bundles_post_ra>
